<compile_context>
chip_gen: v7x
topology: tpu7x:2x2x1
jax: 0.10.0
libtpu: 0.0.40
codegen_flags: <defaults>
</compile_context>

<pallas_src>
import math

import jax
import jax.numpy as jnp
from jax.experimental import pallas as pl
from jax.experimental.pallas import tpu as pltpu


def _round_up(x, m):
    return ((x + m - 1) // m) * m


def _attention_kernel(hs_ref, w_ref, ctx_ref, attn_ref):
    # hs_ref:   (Bt, T, H)  hidden-state slab for Bt batch rows
    # w_ref:    (1, H)      lane-dense attention-weight row
    # ctx_ref:  (Bt, H)     context vectors (lane-dense store)
    # attn_ref: (Bt, T)     attention weights (lane-dense store)
    w = w_ref[...].astype(jnp.float32)                                   # (1, H), tiny

    # scores[b, t] = sum_h hs[b, t, h] * w[h] — VPU multiply + XLU lane reduce.
    # Cast is in-expression (fused per-vreg), no persistent f32 slab.
    scores = jnp.sum(hs_ref[...].astype(jnp.float32) * w, axis=-1)       # (Bt, T)

    # Numerically-stable softmax over the sequence axis (independently per row).
    m = jnp.max(scores, axis=-1, keepdims=True)                          # (Bt, 1)
    e = jnp.exp(scores - m)                                              # (Bt, T)
    denom = jnp.sum(e, axis=-1, keepdims=True)                           # (Bt, 1)
    attn = e / denom                                                     # exact divide

    # context[b, h] = sum_t attn[b, t] * hs[b, t, h] — sublane (T-axis) reduce.
    ctx = jnp.sum(attn[:, :, None] * hs_ref[...].astype(jnp.float32), axis=1)  # (Bt, H)

    ctx_ref[...] = ctx.astype(ctx_ref.dtype)
    attn_ref[...] = attn.astype(attn_ref.dtype)


def _pick_batch_block(B, T, H, itemsize, block_bytes):
    """Rows per grid step, budgeted against the padded VMEM layout."""
    # VMEM layout pads the minor dim to 128 lanes and the second-minor dim to the
    # sublane count (8 for 32-bit, 16 for 16-bit, 32 for 8-bit dtypes).
    sublane = 8 * max(1, 4 // itemsize)
    padded_row_bytes = _round_up(T, sublane) * _round_up(H, 128) * itemsize

    if B <= 8:
        # Single full-batch block: full-extent block shape is always legal.
        return B

    bt = max(1, block_bytes // padded_row_bytes)
    # Keep at least ~4 batch blocks so the "parallel" axis can be sharded across
    # v7x's two TensorCores and the DMA pipeline has work to overlap.
    bt = min(bt, max(8, _round_up(pl.cdiv(B, 4), 8)))
    bt = max(8, (bt // 8) * 8)            # sublane-aligned (Bt, H)/(Bt, T) output blocks
    return min(bt, B)


def attention_layer(hidden_states, attention_weights, *, block_bytes=4 << 20):
    """Pallas equivalent of AttentionLayer.forward.

    hidden_states:      (B, T, H)
    attention_weights:  (H, 1)   (PyTorch parameter layout)
    returns (context_vector (B, H), attention_weights (B, T))
    """
    B, T, H = hidden_states.shape
    dtype = hidden_states.dtype
    itemsize = jnp.dtype(dtype).itemsize
    w_row = attention_weights.reshape(1, H)            # lane-dense weight row

    bt = _pick_batch_block(B, T, H, itemsize, block_bytes)
    grid = (pl.cdiv(B, bt),)

    # TODO(synk): for very long sequences (padded T*H slabs threatening v7x's 64 MiB
    # VMEM even at Bt=8), add a second "arbitrary" grid axis over T with an
    # online-softmax accumulator; not needed at these sizes.

    cost = pl.CostEstimate(
        flops=4 * B * T * H,                     # mul+add for scores, mul+add for context
        transcendentals=B * T,                   # exp
        bytes_accessed=(B * T * H + H + B * H + B * T) * itemsize,
    )

    ctx, attn = pl.pallas_call(
        _attention_kernel,
        out_shape=(
            jax.ShapeDtypeStruct((B, H), dtype),
            jax.ShapeDtypeStruct((B, T), dtype),
        ),
        grid_spec=pltpu.PrefetchScalarGridSpec(
            num_scalar_prefetch=0,
            grid=grid,
            in_specs=[
                pl.BlockSpec((bt, T, H), lambda b: (b, 0, 0)),
                pl.BlockSpec((1, H), lambda b: (0, 0)),
            ],
            out_specs=[
                pl.BlockSpec((bt, H), lambda b: (b, 0)),
                pl.BlockSpec((bt, T), lambda b: (b, 0)),
            ],
        ),
        compiler_params=pltpu.CompilerParams(
            dimension_semantics=("parallel",),          # batch blocks shard across TCs
            vmem_limit_bytes=32 * 1024 * 1024,          # safe on v5e/v6e/v7x
        ),
        cost_estimate=cost,
    )(hidden_states, w_row)
    return ctx, attn


def init_attention_weights(key, hidden_layer_size, dtype=jnp.float32):
    # nn.init.xavier_uniform_ on an (H, 1) tensor: bound = sqrt(6 / (H + 1))
    bound = math.sqrt(6.0 / (hidden_layer_size + 1))
    return jax.random.uniform(key, (hidden_layer_size, 1),
                              minval=-bound, maxval=bound, dtype=dtype)


if __name__ == "__main__":
    key = jax.random.PRNGKey(0)
    k_hs, k_w, k_hs2 = jax.random.split(key, 3)

    def _ref(hs, w):
        # Full-precision reference (avoids bf16 MXU passes in the default-precision
        # einsum so the comparison tolerance reflects the kernel, not the ref).
        scores = jnp.einsum("bth,ho->bt", hs, w, precision=jax.lax.Precision.HIGHEST)
        a = jax.nn.softmax(scores, axis=1)
        c = jnp.einsum("bt,bth->bh", a, hs, precision=jax.lax.Precision.HIGHEST)
        return c, a

    # Small shapes consistent with the GRU attention module.
    B, T, H = 2, 8, 32
    hidden_states = jax.random.normal(k_hs, (B, T, H), dtype=jnp.float32)
    attn_w = init_attention_weights(k_w, H)

    ctx, attn = attention_layer(hidden_states, attn_w)
    jax.block_until_ready((ctx, attn))

    ctx_ref, attn_ref = _ref(hidden_states, attn_w)
    assert ctx.shape == (B, H) and attn.shape == (B, T)
    assert bool(jnp.allclose(ctx, ctx_ref, atol=1e-3, rtol=1e-3))
    assert bool(jnp.allclose(attn, attn_ref, atol=1e-3, rtol=1e-3))
    # Exact softmax normalization: rows sum to 1.
    assert bool(jnp.allclose(jnp.sum(attn, axis=1), 1.0, atol=1e-5))

    # Multi-block path: Bt=8, grid=(3,) — exercises batch blocking + parallel axis.
    B2, T2, H2 = 24, 16, 64
    hs2 = jax.random.normal(k_hs2, (B2, T2, H2), dtype=jnp.float32)
    w2 = init_attention_weights(k_w, H2)
    ctx2, attn2 = attention_layer(hs2, w2, block_bytes=64 * 1024)
    jax.block_until_ready((ctx2, attn2))
    ctx2_ref, attn2_ref = _ref(hs2, w2)
    assert bool(jnp.allclose(ctx2, ctx2_ref, atol=1e-3, rtol=1e-3))
    assert bool(jnp.allclose(attn2, attn2_ref, atol=1e-3, rtol=1e-3))

    print("KERNEL_OK")
</pallas_src>

<mosaic_0001>
module attributes {stable_mosaic.version = 11 : i64} {
  func.func @_attention_kernel(%arg0: i32, %arg1: memref<2x8x32xf32, #tpu.memory_space<vmem>>, %arg2: memref<1x32xf32, #tpu.memory_space<vmem>>, %arg3: memref<2x32xf32, #tpu.memory_space<vmem>>, %arg4: memref<2x8xf32, #tpu.memory_space<vmem>>) attributes {dimension_semantics = [#tpu.dimension_semantics<parallel>], iteration_bounds = array<i64: 1>, scalar_prefetch = 0 : i64, scratch_operands = 0 : i64, tpu.core_type = #tpu.core_type<tc>, window_params = [{transform_indices = @transform_0, window_bounds = array<i64: 2, 8, 32>}, {pipeline_mode = #tpu.pipeline_mode<synchronous>, transform_indices = @transform_1, window_bounds = array<i64: 1, 32>}, {transform_indices = @transform_2, window_bounds = array<i64: 2, 32>}, {transform_indices = @transform_3, window_bounds = array<i64: 2, 8>}]} {
    %c0 = arith.constant 0 : index
    %c0_0 = arith.constant 0 : index
    %0 = vector.load %arg2[%c0, %c0_0] : memref<1x32xf32, #tpu.memory_space<vmem>>, vector<1x32xf32>
    %c0_1 = arith.constant 0 : index
    %c0_2 = arith.constant 0 : index
    %c0_3 = arith.constant 0 : index
    %1 = vector.load %arg1[%c0_1, %c0_2, %c0_3] : memref<2x8x32xf32, #tpu.memory_space<vmem>>, vector<2x8x32xf32>
    %2 = vector.shape_cast %0 : vector<1x32xf32> to vector<1x1x32xf32>
    %3 = vector.broadcast %2 : vector<1x1x32xf32> to vector<2x8x32xf32>
    %4 = arith.mulf %1, %3 : vector<2x8x32xf32>
    %cst = arith.constant dense<0.000000e+00> : vector<2x8xf32>
    %5 = vector.multi_reduction <add>, %4, %cst [2] : vector<2x8x32xf32> to vector<2x8xf32>
    %cst_4 = arith.constant dense<0xFF800000> : vector<2xf32>
    %6 = vector.multi_reduction <maximumf>, %5, %cst_4 [1] : vector<2x8xf32> to vector<2xf32>
    %7 = vector.shape_cast %6 : vector<2xf32> to vector<2x1xf32>
    %8 = vector.broadcast %7 : vector<2x1xf32> to vector<2x8xf32>
    %9 = arith.subf %5, %8 : vector<2x8xf32>
    %10 = math.exp %9 : vector<2x8xf32>
    %cst_5 = arith.constant dense<0.000000e+00> : vector<2xf32>
    %11 = vector.multi_reduction <add>, %10, %cst_5 [1] : vector<2x8xf32> to vector<2xf32>
    %12 = vector.shape_cast %11 : vector<2xf32> to vector<2x1xf32>
    %13 = vector.broadcast %12 : vector<2x1xf32> to vector<2x8xf32>
    %14 = arith.divf %10, %13 : vector<2x8xf32>
    %15 = vector.shape_cast %14 : vector<2x8xf32> to vector<2x8x1xf32>
    %c0_6 = arith.constant 0 : index
    %c0_7 = arith.constant 0 : index
    %c0_8 = arith.constant 0 : index
    %16 = vector.load %arg1[%c0_6, %c0_7, %c0_8] : memref<2x8x32xf32, #tpu.memory_space<vmem>>, vector<2x8x32xf32>
    %17 = vector.broadcast %15 : vector<2x8x1xf32> to vector<2x8x32xf32>
    %18 = arith.mulf %17, %16 : vector<2x8x32xf32>
    %cst_9 = arith.constant dense<0.000000e+00> : vector<2x32xf32>
    %19 = vector.multi_reduction <add>, %18, %cst_9 [1] : vector<2x8x32xf32> to vector<2x32xf32>
    %c0_10 = arith.constant 0 : index
    %c0_11 = arith.constant 0 : index
    %20 = vector.load %arg3[%c0_10, %c0_11] : memref<2x32xf32, #tpu.memory_space<vmem>>, vector<2x32xf32>
    tpu.vector_store %arg3[%c0_10, %c0_11], %19 {strides = array<i32>} : memref<2x32xf32, #tpu.memory_space<vmem>>, vector<2x32xf32>,
    %c0_12 = arith.constant 0 : index
    %c0_13 = arith.constant 0 : index
    %21 = vector.load %arg4[%c0_12, %c0_13] : memref<2x8xf32, #tpu.memory_space<vmem>>, vector<2x8xf32>
    tpu.vector_store %arg4[%c0_12, %c0_13], %14 {strides = array<i32>} : memref<2x8xf32, #tpu.memory_space<vmem>>, vector<2x8xf32>,
    return
  }
  func.func @transform_0(%arg0: i32) -> (i32, i32, i32) {
    %c0_i32 = arith.constant 0 : i32
    %c0_i32_0 = arith.constant 0 : i32
    %c0_i32_1 = arith.constant 0 : i32
    return %arg0, %c0_i32, %c0_i32_0 : i32, i32, i32
  }
  func.func @transform_1(%arg0: i32) -> (i32, i32) {
    %c0_i32 = arith.constant 0 : i32
    %c0_i32_0 = arith.constant 0 : i32
    %c0_i32_1 = arith.constant 0 : i32
    return %c0_i32, %c0_i32_0 : i32, i32
  }
  func.func @transform_2(%arg0: i32) -> (i32, i32) {
    %c0_i32 = arith.constant 0 : i32
    %c0_i32_0 = arith.constant 0 : i32
    return %arg0, %c0_i32 : i32, i32
  }
  func.func @transform_3(%arg0: i32) -> (i32, i32) {
    %c0_i32 = arith.constant 0 : i32
    %c0_i32_0 = arith.constant 0 : i32
    return %arg0, %c0_i32 : i32, i32
  }
}

</mosaic_0001>

<bundles_post_ra>
// kernel: tpu_custom_call.1
= control target key start
LH: loop header
LB: loop body
LE: loop exit
PB: predicated region body
PF: predicated region fallthrough
CT: control target
= control target key end

     0   :  { %9 = vsyncpa [#allocation3], 0  ;;  %s360_s0 = inlined_call_operand.hbm [shape: f32[2,8,32], index: 0, kind: input, shape index: {}]   ;;  %s361_s1 = inlined_call_operand.vmem [shape: f32[1,32], index: 1, kind: input, shape index: {}]   ;;  %s362_s2 = inlined_call_operand.hbm [shape: f32[2,32], index: 2, kind: output, shape index: {0}]   ;;  %s363_s3 = inlined_call_operand.hbm [shape: f32[2,8], index: 3, kind: output, shape index: {1}]  }
   0x1   :  { %10 = vsyncpa [#allocation4], 0 }
   0x2   :  { %11 = vsyncpa [#allocation7], 0  ;;  %s280_s12 = smov [#allocation2]   ;;  %s208_s16 = scalar_lea.hbm %s360_s0, 256 }
   0x3   :  { %s17_s13 = sshll.u32 %s280_s12, 4  ;;  %p209_p0 = scmp.ne.s32.totalorder %s360_s0, %s208_s16  ;;  %s18_s13 = int_to_ptr.vmem [resolvable:$true] %s17_s13 }
   0x4   :  { %p212_p1 = scmp.lt.u32.totalorder %s208_s16, %s360_s0 }
   0x6   :  { %p214_p2 = pnand %p212_p1, %p209_p0 }
   0x8   :  { %217 = shalt.err (!%p214_p2)
}
   0x9   :  { %s218_s21 = scalar_lea.vmem %s18_s13, 256  ;;  %p223_p4 = scmp.lt.s32.totalorder %s18_s13, %s18_s13 }
   0xa   :  { %p219_p3 = scmp.ne.s32.totalorder %s18_s13, %s218_s21  ;;  %p224_p5 = scmp.lt.s32.totalorder %s218_s21, %s218_s21 }
   0xc   :  { %p225_p6 = por %p224_p5, %p223_p4 }
   0xe   :  { %p226_p7 = pnand %p225_p6, %p219_p3 }
  0x10   :  { %229 = shalt.err (!%p226_p7)
}
  0x11   :  { %s281_s22 = smov 128   ;;  %s282_s23 = smov 8  }
  0x12   :  { %23 = dma.hbm_to_vmem [thread:$0]  %s360_s0, 256, %s18_s13, [#allocation3], %s281_s22, %s281_s22, %s282_s23  }
  0x13   :  { %274 = dma.done.wait [#allocation3], 256  }
  0x14   :  { %275 = vsyncadd [#allocation3], 4294967040  ;;  %v191_v0 = vld [vmem:[%s361_s1] ss:$0 sm:$0xff]  ;;  %vm40_vm0 = vcmask 261120   ;;  %v321_v2 = vld [vmem:[#allocation2 + $0x8] sm:$0xff]  ;;  %v49_v7 = vlaneseq }
  0x15   :  { %v30_v1 = vld [vmem:[#allocation2] sm:$0xff]  ;;  %v39_v4 = vmul.f32 %v191_v0, %v321_v2  ;;  %vm59_vm1 = vcmask 1041409   ;;  %vm62_vm2 = vcmask 58368   ;;  %v283_v17 = vmov 0   ;;  %s284_s0 = smov [#allocation6]  }
  0x16   :  { %v38_v3 = vmul.f32 %v191_v0, %v30_v1  ;;  %v50_v8 = vand.u32 127, %v49_v7  ;;  %v52_v9 = vshrl.u32 %v49_v7, 7  ;;  %199 = vset.pattern.permute.xlu0 %v283_v17  ;;  %198 = vset.pattern.permute.xlu1 %v283_v17  ;;  %s178_s1 = sshll.u32 %s284_s0, 4  ;;  %s179_s1 = int_to_ptr.vmem [resolvable:$true] %s178_s1 }
  0x17   :  { %v44_v6 = vsel %vm40_vm0, %v39_v4, 0.0  ;;  %s230_s28 = scalar_lea.vmem %s179_s1, 32  ;;  %p235_p9 = scmp.lt.s32.totalorder %s179_s1, %s179_s1 }
  0x18   :  { %v41_v5 = vsel %vm40_vm0, %v38_v3, 0.0  ;;  %v53_v11 = vsub.s32 %v50_v8, %v52_v9  ;;  %v69_v18 = vsub.s32 0, %v52_v9  ;;  %v73_v19 = vsub.s32 1, %v52_v9  ;;  %p231_p8 = scmp.ne.s32.totalorder %s179_s1, %s230_s28  ;;  %p236_p10 = scmp.lt.s32.totalorder %s230_s28, %s230_s28 }
  0x19   :  { %42 = vadd.xlane.f32.xlu0 %v41_v5 }
  0x1a   :  { %p237_p11 = por %p236_p10, %p235_p9 }
  0x1c   :  { %p238_p12 = pnand %p237_p11, %p231_p8 }
  0x1d   :  { %45 = vadd.xlane.f32.xlu0 %v44_v6 }
  0xa6   :  { %v43_v10 = vpop.xlane.xlu0 %42 }
  0xa7   :  { %v54_v13 = vrot.slane %v43_v10, %v53_v11 }
  0xaa   :  { %v46_v12 = vpop.xlane.xlu0 %45 }
  0xab   :  { %v58_v14 = vrot.slane %v46_v12, %v53_v11 }
  0xad   :  { %v60_v15 = vsel %vm59_vm1, %v58_v14, %v54_v13 }
  0xae   :  { %v63_v16 = vsel %vm62_vm2, %v60_v15, -inf }
  0xaf   :  { %64 = vmax.xlane.f32.xlu1 %v63_v16 }
 0x13c   :  { %v65_v20 = vpop.xlane.xlu1 %64 }
 0x13d   :  { %v70_v21 = vrot.slane %v65_v20, %v69_v18  ;;  %v74_v22 = vrot.slane %v65_v20, %v73_v19 }
 0x13f   :  { %v77_v23 = vsub.f32 %v43_v10, %v70_v21  ;;  %v78_v24 = vsub.f32 %v46_v12, %v74_v22 }
 0x141   :  { %v79_v25 = vmul.f32 1.442695, %v77_v23  ;;  %v81_v26 = vmul.f32 1.442695, %v78_v24 }
 0x143   :  { %200 = vpow2.f32 %v79_v25 }
 0x144   :  { %202 = vpow2.f32 %v81_v26 }
 0x14d   :  { %v201_v27 = vpop.eup %200 }
 0x14e   :  { %v203_v28 = vpop.eup %202  ;;  %86 = vperm.xlu1 %198, %v201_v27  }
 0x14f   :  { %89 = vperm.xlu0 %199, %v203_v28  }
 0x1cd   :  { %v87_v29 = vpop.permute.xlu1 %86 }
 0x1ce   :  { %v90_v30 = vpop.permute.xlu0 %89  ;;  %v94_v31 = vrot.slane %v87_v29, %v53_v11 }
 0x1cf   :  { %v98_v32 = vrot.slane %v90_v30, %v53_v11 }
 0x1d1   :  { %v99_v33 = vsel %vm59_vm1, %v98_v32, %v94_v31 }
 0x1d2   :  { %v101_v34 = vsel %vm62_vm2, %v99_v33, 0.0 }
 0x1d3   :  { %102 = vadd.xlane.f32.xlu1 %v101_v34 }
 0x260   :  { %v103_v35 = vpop.xlane.xlu1 %102 }
 0x261   :  { %v108_v36 = vrot.slane %v103_v35, %v69_v18  ;;  %v112_v37 = vrot.slane %v103_v35, %v73_v19 }
 0x263   :  { %204 = vrcp.f32 %v108_v36 }
 0x264   :  { %206 = vrcp.f32 %v112_v37 }
 0x26d   :  { %v205_v38 = vpop.eup %204 }
 0x26e   :  { %v116_v39 = vmul.f32 %v205_v38, %v201_v27  ;;  %v207_v40 = vpop.eup %206 }
 0x26f   :  { %v118_v41 = vmul.f32 %v207_v40, %v203_v28 }
 0x270   :  { %121 = vperm.xlu0 %199, %v116_v39  }
 0x274   :  { %126 = vperm.xlu0 %199, %v118_v41  }
 0x2ef   :  { %v122_v42 = vpop.permute.xlu0 %121 }
 0x2f0   :  { %v129_v43 = vmul.f32 %v122_v42, %v30_v1  ;;  %v154_v47 = vrot.slane %v122_v42, %v53_v11 }
 0x2f2   :  { %v131_v44 = vsel %vm40_vm0, %v129_v43, 0.0 }
 0x2f3   :  { %v132_v45 = vrot.slane %v131_v44, 4  ;;  %v127_v46 = vpop.permute.xlu0 %126 }
 0x2f4   :  { %v130_v48 = vmul.f32 %v127_v46, %v321_v2  ;;  %v158_v49 = vrot.slane %v127_v46, %v53_v11 }
 0x2f5   :  { %v133_v50 = vadd.f32 %v132_v45, %v131_v44 }
 0x2f6   :  { %v138_v51 = vsel %vm40_vm0, %v130_v48, 0.0  ;;  %v159_v52 = vsel %vm59_vm1, %v158_v49, %v154_v47 }
 0x2f7   :  { %v134_v53 = vrot.slane %v133_v50, 2  ;;  %v139_v54 = vrot.slane %v138_v51, 4  ;;  %161 = vst.msk [vmem:[#allocation6] sm:$0x3] %vm62_vm2, %v159_v52 }
 0x2f8   :  { %241 = shalt.err (!%p238_p12)
}
 0x2f9   :  { %s242_s4 = scalar_lea.hbm %s363_s3, 32 }
 0x2fa   :  { %p243_p13 = scmp.ne.s32.totalorder %s363_s3, %s242_s4  ;;  %p246_p0 = scmp.lt.u32.totalorder %s242_s4, %s363_s3 }
 0x2fc   :  { %p248_p1 = pnand %p246_p0, %p243_p13 }
 0x2fe   :  { %251 = shalt.err (!%p248_p1)
}
 0x2ff   :  { %181 = dma.vmem_to_hbm [thread:$0]  %s179_s1, 32, %s363_s3, [#allocation7]   ;;  %v135_v55 = vadd.f32 %v134_v53, %v133_v50  ;;  %v140_v56 = vadd.f32 %v139_v54, %v138_v51  ;;  %vm149_vm3 = vcmask 254976  }
 0x300   :  { %s285_s11 = smov [#allocation5]  }
 0x301   :  { %v141_v57 = vrot.slane %v140_v56, 2  ;;  %v136_v58 = vrot.slane %v135_v55, 1  ;;  %s168_s12 = sshll.u32 %s285_s11, 4  ;;  %s169_s12 = int_to_ptr.vmem [resolvable:$true] %s168_s12 }
 0x302   :  { %s252_s13 = scalar_lea.vmem %s169_s12, 32  ;;  %p257_p3 = scmp.lt.s32.totalorder %s169_s12, %s169_s12 }
 0x303   :  { %v142_v59 = vadd.f32 %v141_v57, %v140_v56  ;;  %v137_v62 = vadd.f32 %v136_v58, %v135_v55  ;;  %p253_p2 = scmp.ne.s32.totalorder %s169_s12, %s252_s13  ;;  %p258_p4 = scmp.lt.s32.totalorder %s252_s13, %s252_s13 }
 0x305   :  { %v143_v60 = vrot.slane %v142_v59, 1  ;;  %p259_p5 = por %p258_p4, %p257_p3 }
 0x307   :  { %v144_v61 = vadd.f32 %v143_v60, %v142_v59  ;;  %p260_p6 = pnand %p259_p5, %p253_p2 }
 0x309   :  { %v147_v63 = vsel %vm59_vm1, %v144_v61, %v137_v62 }
 0x30a   :  { %150 = vst.msk [vmem:[#allocation5] sm:$0x3] %vm149_vm3, %v147_v63 }
 0x30b   :  { %263 = shalt.err (!%p260_p6)
}
 0x30c   :  { %s264_s15 = scalar_lea.hbm %s362_s2, 32 }
 0x30d   :  { %p265_p7 = scmp.ne.s32.totalorder %s362_s2, %s264_s15  ;;  %p268_p8 = scmp.lt.u32.totalorder %s264_s15, %s362_s2 }
 0x30f   :  { %p270_p9 = pnand %p268_p8, %p265_p7 }
 0x311   :  { %273 = shalt.err (!%p270_p9)
}
 0x312   :  { %171 = dma.vmem_to_hbm [thread:$0]  %s169_s12, 32, %s362_s2, [#allocation4]  }
 0x313   :  { %276 = dma.done.wait [#allocation4], 32  }
 0x314   :  { %277 = vsyncadd [#allocation4], 4294967264 }
 0x315   :  { %278 = dma.done.wait [#allocation7], 32  }
 0x316   :  { %279 = vsyncadd [#allocation7], 4294967264 }
 0x317   :  { %188 = vsyncpa [#allocation3], 1 }
 0x318   :  { %189 = vsyncpa [#allocation4], 1 }
 0x319   :  { %190 = vsyncpa [#allocation7], 1 }

</bundles_post_ra>
